<compile_context>
chip_gen: v6e
topology: v6e:2x2x1
jax: 0.10.0
libtpu: 0.0.40
codegen_flags: <defaults>
</compile_context>

<pallas_src>
import jax
import jax.numpy as jnp
from jax.experimental import pallas as pl
from jax.experimental.pallas import tpu as pltpu


def _adaptive_pool_weights(L: int, par: int, dtype):
    """(par, L) averaging matrix reproducing nn.AdaptiveAvgPool1d windows."""
    i = jnp.arange(par)
    starts = (i * L) // par                       # floor(i*L/par)
    ends = -((-(i + 1) * L) // par)               # ceil((i+1)*L/par)
    l = jnp.arange(L)
    mask = (l[None, :] >= starts[:, None]) & (l[None, :] < ends[:, None])
    counts = (ends - starts).astype(jnp.float32)
    w = mask.astype(jnp.float32) / counts[:, None]
    return w.astype(dtype)


def _pool_kernel(w_ref, x_ref, o_ref):
    # w_ref: (par, L), x_ref: (L, TC), o_ref: (par, TC); f32 accumulation.
    o_ref[...] = jnp.dot(
        w_ref[...], x_ref[...], preferred_element_type=jnp.float32
    ).astype(o_ref.dtype)


def _round_up(x: int, m: int) -> int:
    return ((x + m - 1) // m) * m


def _choose_c_tile(L: int, c_pad: int, itemsize: int,
                   budget_bytes: int = 12 * 1024 * 1024) -> int:
    """Largest 128-multiple divisor of c_pad s.t. the double-buffered x tile
    stays under `budget_bytes` (and <= 2048 lanes per tile)."""
    cap = budget_bytes // max(1, 2 * L * itemsize)
    cap = max(128, min((cap // 128) * 128, 2048, c_pad))
    best = 128
    t = 128
    while t <= cap:
        if c_pad % t == 0:
            best = t
        t += 128
    return best


def t_adaptive_avg_pool1d(vec, par, template=None):
    """vec: (B, L, C) -> (B, par, C). `template` is unused (matches PyTorch)."""
    B, L, C = vec.shape
    itemsize = jnp.dtype(vec.dtype).itemsize

    # Lane-dense output: pad C to a multiple of 128, slice back afterwards.
    c_pad = _round_up(C, 128)
    tc = _choose_c_tile(L, c_pad, itemsize)
    n_c = c_pad // tc

    # Averaging matrix in the input dtype (MXU still accumulates in f32).
    w = _adaptive_pool_weights(L, par, vec.dtype)

    x = vec
    if c_pad != C:
        x = jnp.pad(vec, ((0, 0), (0, 0), (0, c_pad - C)))

    # Double-buffered VMEM footprint: x tile, out tile, W block.
    need = (2 * L * tc + 2 * par * tc + 2 * par * L) * itemsize
    vmem_limit = int(min(max(2 * need, 32 * 1024 * 1024), 48 * 1024 * 1024))

    cost = pl.CostEstimate(
        flops=2 * B * par * L * C,
        transcendentals=0,
        bytes_accessed=(B * L * C + B * par * C + par * L) * itemsize,
    )

    out = pl.pallas_call(
        _pool_kernel,
        out_shape=jax.ShapeDtypeStruct((B, par, c_pad), vec.dtype),
        grid_spec=pltpu.PrefetchScalarGridSpec(
            num_scalar_prefetch=0,
            grid=(B, n_c),
            in_specs=[
                # averaging matrix: same full (par, L) block for every step
                pl.BlockSpec((par, L), lambda b, c: (0, 0)),
                # input: one (L, TC) channel tile per step, batch squeezed
                pl.BlockSpec((pl.Squeezed(), L, tc), lambda b, c: (b, 0, c)),
            ],
            out_specs=pl.BlockSpec((pl.Squeezed(), par, tc),
                                   lambda b, c: (b, 0, c)),
        ),
        compiler_params=pltpu.CompilerParams(
            dimension_semantics=("parallel", "parallel"),
            vmem_limit_bytes=vmem_limit,
        ),
        cost_estimate=cost,
    )(w, x)

    if c_pad != C:
        out = out[:, :, :C]
    return out


def _reference(vec, par):
    """Pure-JAX reference of AdaptiveAvgPool1d over axis 1 of (B, L, C)."""
    B, L, C = vec.shape
    w = _adaptive_pool_weights(L, par, jnp.float32)
    return jnp.einsum("pl,blc->bpc", w, vec.astype(jnp.float32)).astype(vec.dtype)


if __name__ == "__main__":
    key = jax.random.PRNGKey(0)
    B, L, C = 2, 16, 32
    par = 4  # AdaptiveAvgPool1d output size

    k1, k2 = jax.random.split(key)
    vec = jax.random.normal(k1, (B, L, C), dtype=jnp.float32)
    template = jax.random.normal(k2, (B, L, C), dtype=jnp.float32)  # unused

    out = t_adaptive_avg_pool1d(vec, par, template)
    out = jax.block_until_ready(out)

    ref = _reference(vec, par)
    assert out.shape == (B, par, C), out.shape
    assert jnp.allclose(out, ref, atol=1e-5, rtol=1e-5), "mismatch vs reference"

    print("KERNEL_OK")
</pallas_src>

<mosaic_0001>
module attributes {stable_mosaic.version = 11 : i64} {
  func.func @_pool_kernel(%arg0: i32, %arg1: i32, %arg2: memref<4x16xf32, #tpu.memory_space<vmem>>, %arg3: memref<1x16x128xf32, #tpu.memory_space<vmem>>, %arg4: memref<1x4x128xf32, #tpu.memory_space<vmem>>) attributes {dimension_semantics = [#tpu.dimension_semantics<parallel>, #tpu.dimension_semantics<parallel>], iteration_bounds = array<i64: 2, 1>, scalar_prefetch = 0 : i64, scratch_operands = 0 : i64, tpu.core_type = #tpu.core_type<tc>, window_params = [{pipeline_mode = #tpu.pipeline_mode<synchronous>, transform_indices = @transform_0, window_bounds = array<i64: 4, 16>}, {transform_indices = @transform_1, window_bounds = array<i64: 1, 16, 128>}, {transform_indices = @transform_2, window_bounds = array<i64: 1, 4, 128>}]} {
    %c0 = arith.constant 0 : index
    %c0_0 = arith.constant 0 : index
    %0 = vector.load %arg2[%c0, %c0_0] : memref<4x16xf32, #tpu.memory_space<vmem>>, vector<4x16xf32>
    %c0_1 = arith.constant 0 : index
    %c0_2 = arith.constant 0 : index
    %c0_3 = arith.constant 0 : index
    %1 = vector.load %arg3[%c0_1, %c0_2, %c0_3] : memref<1x16x128xf32, #tpu.memory_space<vmem>>, vector<1x16x128xf32>
    %2 = vector.shape_cast %1 : vector<1x16x128xf32> to vector<16x128xf32>
    %cst = arith.constant dense<0.000000e+00> : vector<4x128xf32>
    %3 = tpu.matmul %0, %2, %cst {dimension_numbers = #tpu.dot_dimension_numbers<[1], [0], [0], [1], [0, 0, 1, 1], [], []>} : vector<4x16xf32>, vector<16x128xf32>, vector<4x128xf32> -> vector<4x128xf32>
    %c0_4 = arith.constant 0 : index
    %c0_5 = arith.constant 0 : index
    %c0_6 = arith.constant 0 : index
    %4 = vector.load %arg4[%c0_4, %c0_5, %c0_6] : memref<1x4x128xf32, #tpu.memory_space<vmem>>, vector<1x4x128xf32>
    %5 = vector.shape_cast %4 : vector<1x4x128xf32> to vector<4x128xf32>
    %6 = vector.shape_cast %3 : vector<4x128xf32> to vector<1x4x128xf32>
    tpu.vector_store %arg4[%c0_4, %c0_5, %c0_6], %6 {strides = array<i32>} : memref<1x4x128xf32, #tpu.memory_space<vmem>>, vector<1x4x128xf32>,
    return
  }
  func.func @transform_0(%arg0: i32, %arg1: i32) -> (i32, i32) {
    %c0_i32 = arith.constant 0 : i32
    %c0_i32_0 = arith.constant 0 : i32
    %c0_i32_1 = arith.constant 0 : i32
    return %c0_i32, %c0_i32_0 : i32, i32
  }
  func.func @transform_1(%arg0: i32, %arg1: i32) -> (i32, i32, i32) {
    %c0_i32 = arith.constant 0 : i32
    %c0_i32_0 = arith.constant 0 : i32
    return %arg0, %c0_i32, %arg1 : i32, i32, i32
  }
  func.func @transform_2(%arg0: i32, %arg1: i32) -> (i32, i32, i32) {
    %c0_i32 = arith.constant 0 : i32
    %c0_i32_0 = arith.constant 0 : i32
    return %arg0, %c0_i32, %arg1 : i32, i32, i32
  }
}

</mosaic_0001>

<bundles_post_ra>
// kernel: tpu_custom_call.1
= control target key start
LH: loop header
LB: loop body
LE: loop exit
PB: predicated region body
PF: predicated region fallthrough
CT: control target
= control target key end

     0   :  { %7 = vsyncpa [#allocation3], 0  ;;  %s821_s0 = inlined_call_operand.hbm [shape: f32[4,16], index: 0, kind: input, shape index: {}]   ;;  %s822_s1 = inlined_call_operand.hbm [shape: f32[2,16,128], index: 1, kind: input, shape index: {}]   ;;  %s823_s2 = inlined_call_operand.hbm [shape: f32[2,4,128], index: 2, kind: output, shape index: {}]  }
   0x1   :  { %8 = vsyncpa [#allocation6], 0 }
   0x2   :  { %10 = vsyncpa [#allocation6 + $0x1], 0 }
   0x3   :  { %11 = vsyncpa [#allocation4], 0 }
   0x4   :  { %13 = vsyncpa [#allocation4 + $0x1], 0  ;;  %s645_s9 = smov 0   ;;  %s647_s10 = smov 0  }
   0x5   :  { %s649_s11 = smov 0   ;;  %s651_s12 = smov 0  }
   0x6   :  { %s653_s13 = smov 0   ;;  %s655_s14 = smov 0  }
   0x7 LB: > { %s378_s15 = sadd.s32 4294967295, %s621_s14   ;;  %s379_s16 = sadd.s32 4294967294, %s621_s14   ;;  %s621_s14 = sphi %s655_s14, %s19_s14   ;;  %s617_s13 = sphi %s653_s13, %s842_s13   ;;  %s613_s12 = sphi %s651_s12, %s841_s12   ;;  %s609_s11 = sphi %s649_s11, %s840_s11   ;;  %s605_s10 = sphi %s647_s10, %s839_s10   ;;  %s601_s9 = sphi %s645_s9, %s838_s9  }
   0x8   : > { %s61_s17 = sadd.s32 1, %s609_s11  ;;  %p68_p0 = scmp.ne.s32.totalorder %s609_s11, %s605_s10 }
   0x9   : > { %p69_p1 = scmp.eq.s32.totalorder %s621_s14, 0  ;;  %p74_p2 = scmp.ne.s32.totalorder %s605_s10, %s601_s9 }
   0xa   : > { %p683_p3 = scmp.eq.s32.totalorder %s378_s15, 0  ;;  %p100_p4 = scmp.eq.s32.totalorder %s378_s15, 1 }
   0xb   : > { %p687_p5 = por %p69_p1, %p68_p0  ;;  %p106_p6 = scmp.eq.s32.totalorder %s379_s16, 1 }
   0xc   : > { %p693_p7 = por %p683_p3, %p74_p2  ;;  %p697_p8 = por %p100_p4, %p68_p0 }
   0xd   : > { %p701_p9 = por %p106_p6, %p74_p2  ;;  %p380_p10 = scmp.ge.s32.totalorder %s621_s14, 1 }
   0xe   : > { %s828_s20 = scalar_select %p693_p7, 1, 0 }
   0xf   : > { %s829_s21 = scalar_select %p697_p8, 1, 0 }
  0x10   : > { %s830_s22 = scalar_select %p701_p9, 1, 0 }
  0x11   : > { %p113_p11 = scmp.lt.s32.totalorder %s621_s14, 3  ;;  %s623_s24 = smov [#allocation2]  }
  0x12   : > { %s126_s25 = sshll.u32 %s623_s24, 4  ;;  %p427_p1 = scmp.lt.s32.totalorder %s621_s14, 2  ;;  %s127_s25 = int_to_ptr.vmem [resolvable:$true] %s126_s25 }
  0x13   : > { %p708_p13 = pnand %p380_p10, %p113_p11  ;;  %s31_s28 = sadd.s32 1, %s617_s13 }
  0x14   : > { %p717_p4 = pnand %p427_p1, %p687_p5  ;;  %p33_p6 = scmp.ge.s32.totalorder %s31_s28, 2 }
  0x15   : > { %p414_p0 = pneg %p708_p13  ;;  %s137_s29 = sand.u32 1, %s609_s11  }
  0x16   : > { %s494_s30 = scalar_lea.vmem %s127_s25, 64  ;;  %p502_p8 = scmp.lt.s32.totalorder %s127_s25, %s127_s25 }
  0x17   : > { %p723_p2 = pnand %p414_p0, %p683_p3  ;;  %p495_p11 = scmp.ne.s32.totalorder %s127_s25, %s494_s30 }
  0x18   : > { %p503_p5 = scmp.lt.s32.totalorder %s494_s30, %s494_s30 }
  0x19   : > { %p485_p10 = pneg %p723_p2 }
  0x1a   : > { %p504_p1 = por %p503_p5, %p502_p8 }
  0x1b   : > { %p497_p12 = pnand %p495_p11, %p485_p10 }
  0x1d   : > { %p498_p9 = pneg %p497_p12 }
  0x1f   : > { %p505_p7 = pnand %p504_p1, %p498_p9 }
  0x21   : > { %508 = shalt.err (!%p505_p7)
}
  0x22   : > { %417 = dma.hbm_to_vmem [thread:$0]  (!%p723_p2), %s821_s0, 64, %s127_s25, [#allocation3]  }
  0x23   : > { %s844_s28 = smov (%p33_p6, %s31_s28), 0  ;;  %s383_s5 = sshll.u32 %s137_s29, 4 }
  0x24   : > { %s56_s6 = ssub.s32 %s617_s13, %s844_s28  ;;  %s395_s7 = sshll.u32 %s617_s13, 8 }
  0x25   : > { %p59_p12 = scmp.eq.s32.totalorder %s56_s6, 0  ;;  %s148_s16 = scalar_lea.hbm %s822_s1, %s395_s7 }
  0x26   : > { %s141_s19 = scalar_lea.vmem [#allocation5], %s383_s5  ;;  %s138_s30 = scalar_lea.sflag [#allocation6], %s137_s29 }
  0x27   : > { %s149_s24 = sshll.u32 %s141_s19, 4  ;;  %p511_p7 = pneg %p717_p4  ;;  %s150_s24 = int_to_ptr.vmem [resolvable:$true] %s149_s24 }
  0x28   : > { %s747_s27 = scalar_select %p59_p12, %s609_s11, %s61_s17  }
  0x29   : > { %s522_s25 = scalar_lea.vmem %s150_s24, 256  ;;  %s624_s3 = smov [#allocation5]  }
  0x2a   : > { %p523_p8 = scmp.ne.s32.totalorder %s150_s24, %s522_s25  ;;  %s527_s4 = sshll.u32 %s624_s3, 4  ;;  %s528_s4 = int_to_ptr.vmem [resolvable:$false] %s527_s4 }
  0x2b   : > { %s529_s6 = scalar_lea.vmem %s528_s4, 512  ;;  %p530_p2 = scmp.lt.s32.totalorder %s150_s24, %s528_s4 }
  0x2c   : > { %p525_p9 = pnand %p523_p8, %p511_p7  ;;  %p531_p6 = scmp.lt.s32.totalorder %s529_s6, %s522_s25 }
  0x2e   : > { %p526_p0 = pneg %p525_p9  ;;  %p532_p10 = por %p531_p6, %p530_p2 }
  0x30   : > { %p533_p11 = pnand %p532_p10, %p526_p0 }
  0x32   : > { %536 = shalt.err (!%p533_p11)
}
  0x33   : > { %s625_s5 = smov 128   ;;  %s626_s17 = smov 8  }
  0x34   : > { %421 = dma.hbm_to_vmem [thread:$0]  (!%p717_p4), %s148_s16, 256, %s150_s24, %s138_s30, %s625_s5, %s625_s5, %s626_s17  }
  0x35   : > { %161 = sbr.rel (%p708_p13) target bundleno = 275 (0x113), region = 28 }
  0x3a   : > { %588 = dma.done.wait (%p683_p3), [#allocation3], 64  }
  0x3b   : > { %590 = vsyncadd (%p683_p3), [#allocation3], 4294967232  ;;  %s760_s29 = sand.u32 1, %s605_s10   ;;  %p834_p5 = scmp.ne.s32.totalorder %s828_s20, 0 }
  0x3c   : > { %s388_s7 = sshll.u32 %s760_s29, 4  ;;  %s168_s8 = scalar_lea.sflag [#allocation6], %s760_s29 }
  0x3d   : > { %s171_s15 = scalar_lea.vmem [#allocation5], %s388_s7 }
  0x3e   : > { %592 = dma.done.wait (%p834_p5), %s168_s8, 256  }
  0x3f   : > { %594 = vsyncadd (%p834_p5), %s168_s8, 4294967040  ;;  %v627_v0 = vmov 0.0   ;;  %vm628_vm0 = vmmov 0   ;;  %v194_v1 = vld [vmem:[%s171_s15 + $0x8] sm:$0xff]  ;;  %v193_v2 = vld [vmem:[%s171_s15] sm:$0xff]  ;;  %vm195_vm1 = vcmask 130048  }
  0x40   : > { %399 = vmatprep.subr.mxu0 %v627_v0  ;;  %403 = vmatprep.mubr.msk.f32.mxu0 %vm628_vm0, %v627_v0  ;;  %v192_v3 = vld [vmem:[#allocation2] sm:$0xf]  ;;  %s389_s18 = sshll.u32 %s760_s29, 2  ;;  %s392_s26 = sshll.u32 %s613_s12, 6 }
  0x41   : > { %400 = vmatpush3.msra.mxu0 %v194_v1  ;;  %s191_s23 = scalar_lea.vmem [#allocation7], %s389_s18  ;;  %s775_s24 = scalar_lea.hbm %s823_s2, %s392_s26 }
  0x42   : > { %401 = vmatprep.subr.mxu0 %v627_v0  ;;  %s285_s20 = sshll.u32 %s191_s23, 4  ;;  %s271_s30 = scalar_lea.sflag [#allocation4], %s760_s29  ;;  %s770_s20 = int_to_ptr.vmem [resolvable:$true] %s285_s20 }
  0x43   : > { %402 = vmatpush3.msra.mxu0 %v193_v2  ;;  %s537_s25 = scalar_lea.vmem %s770_s20, 64  ;;  %p835_p13 = scmp.ne.s32.totalorder %s829_s21, 0 }
  0x44   : > { %404 = vmatmul.mubr.msk.f32.vlgmr.msra.gmra.mxu0 %vm195_vm1, %v192_v3  ;;  %p538_p3 = scmp.ne.s32.totalorder %s770_s20, %s537_s25  ;;  %s629_s12 = smov [#allocation7]  }
  0x45   : > { %s541_s3 = sshll.u32 %s629_s12, 4  ;;  %s542_s3 = int_to_ptr.vmem [resolvable:$false] %s541_s3 }
  0x46   : > { %p539_p4 = pnand %p538_p3, %p835_p13  ;;  %s543_s4 = scalar_lea.vmem %s542_s3, 128 }
  0x47   : > { %p544_p12 = scmp.lt.s32.totalorder %s770_s20, %s542_s3  ;;  %p545_p7 = scmp.lt.s32.totalorder %s543_s4, %s537_s25 }
  0x48   : > { %p540_p1 = pneg %p539_p4 }
  0x49   : > { %p546_p8 = por %p545_p7, %p544_p12 }
  0x4b   : > { %p547_p9 = pnand %p546_p8, %p540_p1 }
 0x104   : > { %v265_v4 = vpop.f32.mrf.mxu0 }
 0x105   : > { %269 = vst [vmem:[%s191_s23] sm:$0xf] %v265_v4 }
 0x106   : > { %v405_v5 = vpop.f32.mrf.mxu0 }
 0x107   : > { %550 = shalt.err (!%p547_p9)
}
 0x108   : > { %s551_s6 = scalar_lea.hbm %s775_s24, 64  ;;  %s555_s29 = scalar_lea.hbm %s823_s2, 128 }
 0x109   : > { %p552_p0 = scmp.ne.s32.totalorder %s775_s24, %s551_s6  ;;  %p556_p10 = scmp.lt.s32.totalorder %s775_s24, %s823_s2 }
 0x10a   : > { %p557_p11 = scmp.lt.s32.totalorder %s555_s29, %s551_s6 }
 0x10b   : > { %p553_p2 = pnand %p552_p0, %p835_p13 }
 0x10c   : > { %p558_p5 = por %p557_p11, %p556_p10 }
 0x10d   : > { %p554_p6 = pneg %p553_p2 }
 0x10f   : > { %p559_p3 = pnand %p558_p5, %p554_p6 }
 0x111   : > { %562 = shalt.err (!%p559_p3)
}
 0x112   : > { %412 = dma.vmem_to_hbm [thread:$0]  (%p835_p13), %s770_s20, 64, %s775_s24, %s271_s30  }
 0x113 PF: > { %s297_s15 = sand.u32 1, %s601_s9   ;;  %p836_p4 = scmp.ne.s32.totalorder %s830_s22, 0 }
 0x114   : > { %p837_p1 = scmp.ge.s32.totalorder %s621_s14, 2  ;;  %s298_s18 = scalar_lea.sflag [#allocation4], %s297_s15 }
 0x116   : > { %p423_p12 = pnand %p837_p1, %p836_p4 }
 0x118   : > { %p424_p7 = pneg %p423_p12 }
 0x11a   : > { %596 = dma.done.wait (%p424_p7), %s298_s18, 64  }
 0x11b   : > { %598 = vsyncadd (%p424_p7), %s298_s18, 4294967232  ;;  %s19_s14 = sadd.s32 1, %s621_s14   ;;  %s838_s9 = smov %s605_s10 }
 0x11c   : > { %p16_p8 = scmp.ge.s32.totalorder %s19_s14, 4   ;;  %s839_s10 = smov %s609_s11 }
 0x11d   : > { %s840_s11 = smov %s747_s27  ;;  %s841_s12 = smov %s617_s13 }
 0x11e   : > { %s842_s13 = smov %s844_s28  ;;  %18 = sbr.rel (!%p16_p8) target bundleno = 7 (0x7), region = 78 }
 0x123   :  { %303 = vsyncpa [#allocation3], 1 }
 0x124   :  { %305 = vsyncpa [#allocation3 + $0x1], 1 }
 0x125   :  { %306 = vsyncpa [#allocation6], 1 }
 0x126   :  { %308 = vsyncpa [#allocation6 + $0x1], 1 }
 0x127   :  { %309 = vsyncpa [#allocation4], 1 }
 0x128   :  { %311 = vsyncpa [#allocation4 + $0x1], 1 }

</bundles_post_ra>
